<compile_context>
chip_gen: v5e
topology: v5e:2x2
jax: 0.10.0
libtpu: 0.0.40
codegen_flags: <defaults>
</compile_context>

<pallas_src>
import functools

import jax
import jax.numpy as jnp
from jax import lax
from jax.experimental import pallas as pl
from jax.experimental.pallas import tpu as pltpu


# ----------------------------------------------------------------------------
# Pallas kernel: fused (patch-rows @ W^T + b) + LayerNorm, one row-block/step.
# ----------------------------------------------------------------------------
def _patch_embed_kernel(p_ref, wt_ref, b_ref, g_ref, beta_ref, o_ref, *, eps):
    # p_ref: (R, K) im2col patch rows    wt_ref: (K, C) pre-transposed weight
    # b_ref / g_ref / beta_ref: (1, C)   o_ref: (R, C)
    y = jnp.dot(p_ref[...], wt_ref[...], preferred_element_type=jnp.float32)
    y = y + b_ref[...]                                   # conv bias

    mean = jnp.mean(y, axis=-1, keepdims=True)           # LayerNorm over C
    yc = y - mean
    var = jnp.mean(yc * yc, axis=-1, keepdims=True)
    inv = lax.rsqrt(var + eps)                           # EUP slot
    out = yc * inv * g_ref[...] + beta_ref[...]

    o_ref[...] = out.astype(o_ref.dtype)


# ----------------------------------------------------------------------------
# Host-side glue: im2col (layout only) and the pallas_call wrapper.
# ----------------------------------------------------------------------------
def _im2col(x, ps, stride):
    """x: (N, Cin, H, W) -> (N, Hout*Wout, Cin*ps*ps), flatten order (ci,kh,kw)."""
    n, cin, h, w = x.shape
    hout = (h - ps) // stride + 1
    wout = (w - ps) // stride + 1
    if stride == ps and h % ps == 0 and w % ps == 0:
        p = x.reshape(n, cin, hout, ps, wout, ps)
        p = p.transpose(0, 2, 4, 1, 3, 5)                # (N, Ho, Wo, Cin, ps, ps)
    else:
        ih = (jnp.arange(hout) * stride)[:, None] + jnp.arange(ps)[None, :]
        iw = (jnp.arange(wout) * stride)[:, None] + jnp.arange(ps)[None, :]
        p = x[:, :, ih[:, :, None, None], iw[None, None, :, :]]
        p = p.transpose(0, 2, 4, 1, 3, 5)                # (N, Ho, Wo, Cin, ps, ps)
    return p.reshape(n, hout * wout, cin * ps * ps), hout, wout


def _choose_tile_rows(rows, max_tile=256):
    """Largest MXU-friendly row block that doesn't blow up padding waste."""
    rows8 = ((rows + 7) // 8) * 8                        # sublane multiple
    return min(max_tile, rows8)


def patch_embed_forward(x, w_conv, b_conv, gamma, beta, patch_size, stride,
                        eps=1e-5, max_tile_rows=256):
    """Matches PatchEmbeding.forward: returns (out_NLC, h, w)."""
    n, cin, _, _ = x.shape
    cout = w_conv.shape[0]
    k = cin * patch_size * patch_size

    patches, hout, wout = _im2col(x, patch_size, stride)     # (N, L, K)
    seq = hout * wout
    rows = n * seq
    p2 = patches.reshape(rows, k)

    # Pad the row count so every grid step sees a full row block.
    tile_rows = _choose_tile_rows(rows, max_tile_rows)
    rows_p = pl.cdiv(rows, tile_rows) * tile_rows
    if rows_p != rows:
        p2 = jnp.pad(p2, ((0, rows_p - rows), (0, 0)))

    # One-time host-side weight reshape/transpose: (Cout, Cin, ps, ps) -> (K, Cout)
    wt = w_conv.reshape(cout, k).T
    b2 = b_conv.reshape(1, cout)
    g2 = gamma.reshape(1, cout)
    be2 = beta.reshape(1, cout)

    kernel = functools.partial(_patch_embed_kernel, eps=eps)
    out = pl.pallas_call(
        kernel,
        out_shape=jax.ShapeDtypeStruct((rows_p, cout), x.dtype),
        grid=(rows_p // tile_rows,),
        in_specs=[
            pl.BlockSpec((tile_rows, k), lambda i: (i, 0)),  # patch rows
            pl.BlockSpec((k, cout), lambda i: (0, 0)),       # W^T (VMEM-resident)
            pl.BlockSpec((1, cout), lambda i: (0, 0)),       # conv bias
            pl.BlockSpec((1, cout), lambda i: (0, 0)),       # LN gamma
            pl.BlockSpec((1, cout), lambda i: (0, 0)),       # LN beta
        ],
        out_specs=pl.BlockSpec((tile_rows, cout), lambda i: (i, 0)),
        compiler_params=pltpu.CompilerParams(
            dimension_semantics=("parallel",)),
    )(p2, wt, b2, g2, be2)

    out = out[:rows].reshape(n, seq, cout)
    return out, hout, wout


# ----------------------------------------------------------------------------
# Pure-JAX reference (Conv2d + NCHW->NLC + LayerNorm) for verification.
# ----------------------------------------------------------------------------
def patch_embed_ref(x, w_conv, b_conv, gamma, beta, patch_size, stride,
                    eps=1e-5):
    y = lax.conv_general_dilated(
        x, w_conv, window_strides=(stride, stride), padding="VALID",
        dimension_numbers=("NCHW", "OIHW", "NCHW"))
    y = y + b_conv[None, :, None, None]
    n, c, h, w = y.shape
    y = y.reshape(n, c, h * w).transpose(0, 2, 1)            # NCHW -> NLC
    mean = y.mean(-1, keepdims=True)
    var = ((y - mean) ** 2).mean(-1, keepdims=True)
    out = (y - mean) / jnp.sqrt(var + eps) * gamma + beta
    return out, h, w


# ----------------------------------------------------------------------------
if __name__ == "__main__":
    in_channels = 4
    embed_dim = 32
    patch_size = 4
    stride = 4
    N, H_in, W_in = 2, 16, 16

    key = jax.random.PRNGKey(0)
    k_x, k_w, k_b, k_g, k_be = jax.random.split(key, 5)

    x = jax.random.normal(k_x, (N, in_channels, H_in, W_in), dtype=jnp.float32)
    w_conv = 0.05 * jax.random.normal(
        k_w, (embed_dim, in_channels, patch_size, patch_size), dtype=jnp.float32)
    b_conv = 0.01 * jax.random.normal(k_b, (embed_dim,), dtype=jnp.float32)
    gamma = 1.0 + 0.1 * jax.random.normal(k_g, (embed_dim,), dtype=jnp.float32)
    beta = 0.1 * jax.random.normal(k_be, (embed_dim,), dtype=jnp.float32)

    out, h, w = patch_embed_forward(x, w_conv, b_conv, gamma, beta,
                                    patch_size, stride)
    out = jax.block_until_ready(out)

    ref, h_ref, w_ref = patch_embed_ref(x, w_conv, b_conv, gamma, beta,
                                        patch_size, stride)
    assert (h, w) == (h_ref, w_ref) == (4, 4), (h, w, h_ref, w_ref)
    assert out.shape == (N, h * w, embed_dim), out.shape
    assert jnp.allclose(out, ref, atol=1e-4, rtol=1e-4), (
        float(jnp.max(jnp.abs(out - ref))))

    print("KERNEL_OK")
</pallas_src>

<mosaic_0001>
module attributes {stable_mosaic.version = 11 : i64} {
  func.func @_patch_embed_kernel(%arg0: i32, %arg1: memref<32x64xf32, #tpu.memory_space<vmem>>, %arg2: memref<64x32xf32, #tpu.memory_space<vmem>>, %arg3: memref<1x32xf32, #tpu.memory_space<vmem>>, %arg4: memref<1x32xf32, #tpu.memory_space<vmem>>, %arg5: memref<1x32xf32, #tpu.memory_space<vmem>>, %arg6: memref<32x32xf32, #tpu.memory_space<vmem>>) attributes {dimension_semantics = [#tpu.dimension_semantics<parallel>], iteration_bounds = array<i64: 1>, scalar_prefetch = 0 : i64, scratch_operands = 0 : i64, tpu.core_type = #tpu.core_type<tc>, window_params = [{transform_indices = @transform_0, window_bounds = array<i64: 32, 64>}, {pipeline_mode = #tpu.pipeline_mode<synchronous>, transform_indices = @transform_1, window_bounds = array<i64: 64, 32>}, {pipeline_mode = #tpu.pipeline_mode<synchronous>, transform_indices = @transform_2, window_bounds = array<i64: 1, 32>}, {pipeline_mode = #tpu.pipeline_mode<synchronous>, transform_indices = @transform_3, window_bounds = array<i64: 1, 32>}, {pipeline_mode = #tpu.pipeline_mode<synchronous>, transform_indices = @transform_4, window_bounds = array<i64: 1, 32>}, {transform_indices = @transform_5, window_bounds = array<i64: 32, 32>}]} {
    %c0 = arith.constant 0 : index
    %c0_0 = arith.constant 0 : index
    %0 = vector.load %arg1[%c0, %c0_0] : memref<32x64xf32, #tpu.memory_space<vmem>>, vector<32x64xf32>
    %c0_1 = arith.constant 0 : index
    %c0_2 = arith.constant 0 : index
    %1 = vector.load %arg2[%c0_1, %c0_2] : memref<64x32xf32, #tpu.memory_space<vmem>>, vector<64x32xf32>
    %cst = arith.constant dense<0.000000e+00> : vector<32x32xf32>
    %2 = tpu.matmul %0, %1, %cst {dimension_numbers = #tpu.dot_dimension_numbers<[1], [0], [0], [1], [0, 0, 1, 1], [], []>} : vector<32x64xf32>, vector<64x32xf32>, vector<32x32xf32> -> vector<32x32xf32>
    %c0_3 = arith.constant 0 : index
    %c0_4 = arith.constant 0 : index
    %3 = vector.load %arg3[%c0_3, %c0_4] : memref<1x32xf32, #tpu.memory_space<vmem>>, vector<1x32xf32>
    %4 = vector.broadcast %3 : vector<1x32xf32> to vector<32x32xf32>
    %5 = arith.addf %2, %4 : vector<32x32xf32>
    %cst_5 = arith.constant dense<0.000000e+00> : vector<32xf32>
    %6 = vector.multi_reduction <add>, %5, %cst_5 [1] : vector<32x32xf32> to vector<32xf32>
    %7 = vector.shape_cast %6 : vector<32xf32> to vector<32x1xf32>
    %cst_6 = arith.constant 3.200000e+01 : f32
    %8 = vector.broadcast %cst_6 : f32 to vector<32x1xf32>
    %9 = arith.divf %7, %8 : vector<32x1xf32>
    %10 = vector.broadcast %9 : vector<32x1xf32> to vector<32x32xf32>
    %11 = arith.subf %5, %10 : vector<32x32xf32>
    %12 = arith.mulf %11, %11 : vector<32x32xf32>
    %cst_7 = arith.constant dense<0.000000e+00> : vector<32xf32>
    %13 = vector.multi_reduction <add>, %12, %cst_7 [1] : vector<32x32xf32> to vector<32xf32>
    %14 = vector.shape_cast %13 : vector<32xf32> to vector<32x1xf32>
    %cst_8 = arith.constant 3.200000e+01 : f32
    %15 = vector.broadcast %cst_8 : f32 to vector<32x1xf32>
    %16 = arith.divf %14, %15 : vector<32x1xf32>
    %cst_9 = arith.constant 9.99999974E-6 : f32
    %17 = vector.broadcast %cst_9 : f32 to vector<32x1xf32>
    %18 = arith.addf %16, %17 : vector<32x1xf32>
    %19 = math.rsqrt %18 : vector<32x1xf32>
    %20 = vector.broadcast %19 : vector<32x1xf32> to vector<32x32xf32>
    %21 = arith.mulf %11, %20 : vector<32x32xf32>
    %c0_10 = arith.constant 0 : index
    %c0_11 = arith.constant 0 : index
    %22 = vector.load %arg4[%c0_10, %c0_11] : memref<1x32xf32, #tpu.memory_space<vmem>>, vector<1x32xf32>
    %23 = vector.broadcast %22 : vector<1x32xf32> to vector<32x32xf32>
    %24 = arith.mulf %21, %23 : vector<32x32xf32>
    %c0_12 = arith.constant 0 : index
    %c0_13 = arith.constant 0 : index
    %25 = vector.load %arg5[%c0_12, %c0_13] : memref<1x32xf32, #tpu.memory_space<vmem>>, vector<1x32xf32>
    %26 = vector.broadcast %25 : vector<1x32xf32> to vector<32x32xf32>
    %27 = arith.addf %24, %26 : vector<32x32xf32>
    %c0_14 = arith.constant 0 : index
    %c0_15 = arith.constant 0 : index
    %28 = vector.load %arg6[%c0_14, %c0_15] : memref<32x32xf32, #tpu.memory_space<vmem>>, vector<32x32xf32>
    tpu.vector_store %arg6[%c0_14, %c0_15], %27 {strides = array<i32>} : memref<32x32xf32, #tpu.memory_space<vmem>>, vector<32x32xf32>,
    return
  }
  func.func @transform_0(%arg0: i32) -> (i32, i32) {
    %c0_i32 = arith.constant 0 : i32
    %c0_i32_0 = arith.constant 0 : i32
    return %arg0, %c0_i32 : i32, i32
  }
  func.func @transform_1(%arg0: i32) -> (i32, i32) {
    %c0_i32 = arith.constant 0 : i32
    %c0_i32_0 = arith.constant 0 : i32
    %c0_i32_1 = arith.constant 0 : i32
    return %c0_i32, %c0_i32_0 : i32, i32
  }
  func.func @transform_2(%arg0: i32) -> (i32, i32) {
    %c0_i32 = arith.constant 0 : i32
    %c0_i32_0 = arith.constant 0 : i32
    %c0_i32_1 = arith.constant 0 : i32
    return %c0_i32, %c0_i32_0 : i32, i32
  }
  func.func @transform_3(%arg0: i32) -> (i32, i32) {
    %c0_i32 = arith.constant 0 : i32
    %c0_i32_0 = arith.constant 0 : i32
    %c0_i32_1 = arith.constant 0 : i32
    return %c0_i32, %c0_i32_0 : i32, i32
  }
  func.func @transform_4(%arg0: i32) -> (i32, i32) {
    %c0_i32 = arith.constant 0 : i32
    %c0_i32_0 = arith.constant 0 : i32
    %c0_i32_1 = arith.constant 0 : i32
    return %c0_i32, %c0_i32_0 : i32, i32
  }
  func.func @transform_5(%arg0: i32) -> (i32, i32) {
    %c0_i32 = arith.constant 0 : i32
    %c0_i32_0 = arith.constant 0 : i32
    return %arg0, %c0_i32 : i32, i32
  }
}

</mosaic_0001>

<bundles_post_ra>
// kernel: tpu_custom_call.1
= control target key start
LH: loop header
LB: loop body
LE: loop exit
PB: predicated region body
PF: predicated region fallthrough
CT: control target
= control target key end

     0   :  { %s393_s0 = inlined_call_operand.vmem [shape: f32[32,64], index: 0, kind: input, shape index: {}]   ;;  %s394_s1 = inlined_call_operand.vmem [shape: f32[64,32], index: 1, kind: input, shape index: {}]   ;;  %s395_s2 = inlined_call_operand.vmem [shape: f32[1,32], index: 2, kind: input, shape index: {}]   ;;  %s396_s3 = inlined_call_operand.vmem [shape: f32[1,32], index: 3, kind: input, shape index: {}]   ;;  %s397_s4 = inlined_call_operand.vmem [shape: f32[1,32], index: 4, kind: input, shape index: {}]   ;;  %s398_s5 = inlined_call_operand.hbm [shape: f32[32,32], index: 5, kind: output, shape index: {}]  }
   0x1   :  { %v32_v0 = vld [vmem:[%s394_s1 + $0x38] sm:$0xff]  ;;  %v31_v1 = vld [vmem:[%s394_s1 + $0x30] sm:$0xff]  ;;  %v30_v2 = vld [vmem:[%s394_s1 + $0x28] sm:$0xff] }
   0x2   :  { %58 = vmatpush.msra.mxu0 %v32_v0  ;;  %218 = vmatpush.msra.mxu2 %v32_v0  ;;  %v29_v3 = vld [vmem:[%s394_s1 + $0x20] sm:$0xff] }
   0x3   :  { %217 = vmatpush.msra.mxu1 %v32_v0  ;;  %219 = vmatpush.msra.mxu3 %v32_v0 }
   0x4   :  { %59 = vmatpush.msra.mxu0 %v31_v1  ;;  %221 = vmatpush.msra.mxu2 %v31_v1 }
   0x5   :  { %220 = vmatpush.msra.mxu1 %v31_v1  ;;  %222 = vmatpush.msra.mxu3 %v31_v1 }
   0x6   :  { %60 = vmatpush.msra.mxu0 %v30_v2  ;;  %224 = vmatpush.msra.mxu2 %v30_v2 }
   0x7   :  { %10 = vsyncpa [#allocation3], 0  ;;  %v28_v4 = vld [vmem:[%s394_s1 + $0x18] sm:$0xff]  ;;  %223 = vmatpush.msra.mxu1 %v30_v2  ;;  %225 = vmatpush.msra.mxu3 %v30_v2  ;;  %v27_v5 = vld [vmem:[%s394_s1 + $0x10] sm:$0xff]  ;;  %vm37_vm0 = vcmask 523264   ;;  %vm79_vm1 = vcmask 261120  }
   0x8   :  { %61 = vmatpush.msra.mxu0 %v29_v3  ;;  %227 = vmatpush.msra.mxu2 %v29_v3  ;;  %v26_v6 = vld [vmem:[%s394_s1 + $0x8] sm:$0xff]  ;;  %v25_v7 = vld [vmem:[%s394_s1] sm:$0xff]  ;;  %v23_v9 = vld [vmem:[%s393_s0 + $0x10] sm:$0xff]  ;;  %v284_v25 = vmov 32.0   ;;  %s201_s22 = sshll.u32 %s398_s5, 4  ;;  %s286_s23 = smov 128   ;;  %s202_s22 = int_to_ptr.hbm [resolvable:$true] %s201_s22 }
   0x9   :  { %226 = vmatpush.msra.mxu1 %v29_v3  ;;  %228 = vmatpush.msra.mxu3 %v29_v3  ;;  %v21_v8 = vld [vmem:[%s393_s0] sm:$0xff]  ;;  %v22_v10 = vld [vmem:[%s393_s0 + $0x8] sm:$0xff]  ;;  %v24_v11 = vld [vmem:[%s393_s0 + $0x18] sm:$0xff]  ;;  %248 = vrcp.f32 %v284_v25  ;;  %s287_s24 = smov 8  }
   0xa   :  { %62 = vmatpush.msra.mxu0 %v28_v4  ;;  %230 = vmatpush.msra.mxu2 %v28_v4  ;;  %v245_v12 = vld [vmem:[%s395_s2] ss:$0 sm:$0xff] }
   0xb   :  { %229 = vmatpush.msra.mxu1 %v28_v4  ;;  %231 = vmatpush.msra.mxu3 %v28_v4 }
   0xc   :  { %63 = vmatpush.msra.mxu0 %v27_v5  ;;  %233 = vmatpush.msra.mxu2 %v27_v5 }
   0xd   :  { %232 = vmatpush.msra.mxu1 %v27_v5  ;;  %234 = vmatpush.msra.mxu3 %v27_v5 }
   0xe   :  { %64 = vmatpush.msra.mxu0 %v26_v6  ;;  %236 = vmatpush.msra.mxu2 %v26_v6 }
   0xf   :  { %235 = vmatpush.msra.mxu1 %v26_v6  ;;  %237 = vmatpush.msra.mxu3 %v26_v6  ;;  %v249_v26 = vpop.eup %248 }
  0x10   :  { %65 = vmatpush.msra.mxu0 %v25_v7  ;;  %239 = vmatpush.msra.mxu2 %v25_v7  ;;  %v93_v27 = vmul.f32 32.0, %v249_v26  ;;  %vm97_vm2 = vweird.f32 %v249_v26 }
  0x11   :  { %213 = vmatmul.msk.f32.vlgmr.msra.gmra.mxu0 %vm37_vm0, %v21_v8  ;;  %215 = vmatmul.msk.f32.vlgmr.msra.gmra.mxu2 %vm37_vm0, %v23_v9 }
  0x12   :  { %238 = vmatpush.msra.mxu1 %v25_v7  ;;  %240 = vmatpush.msra.mxu3 %v25_v7  ;;  %v94_v28 = vsub.f32 1.0, %v93_v27 }
  0x13   :  { %214 = vmatmul.msk.f32.vlgmr.msra.gmra.mxu1 %vm37_vm0, %v22_v10  ;;  %216 = vmatmul.msk.f32.vlgmr.msra.gmra.mxu3 %vm37_vm0, %v24_v11  ;;  %v246_v11 = vld [vmem:[%s396_s3] ss:$0 sm:$0xff]  ;;  %s285_s3 = smov [#allocation2]  }
  0x14   :  { %v95_v29 = vmul.f32 %v249_v26, %v94_v28 }
  0x16   :  { %v96_v30 = vadd.f32 %v249_v26, %v95_v29 }
  0x18   :  { %v98_v31 = vsel %vm97_vm2, %v249_v26, %v96_v30 }
  0x8e   :  { %v67_v13 = vpop.f32.mrf.mxu0 }
  0x8f   :  { %v68_v14 = vadd.f32 %v245_v12, %v67_v13 }
  0x90   :  { %v70_v15 = vpop.f32.mrf.mxu1 }
  0x91   :  { %v80_v16 = vsel %vm79_vm1, %v68_v14, 0.0  ;;  %v71_v17 = vadd.f32 %v245_v12, %v70_v15  ;;  %v247_v15 = vld [vmem:[%s397_s4] ss:$0 sm:$0xff]  ;;  %s199_s4 = sshll.u32 %s285_s3, 4  ;;  %s200_s4 = int_to_ptr.vmem [resolvable:$true] %s199_s4 }
  0x92   :  { %81 = vadd.xlane.f32.xlu0 %v80_v16 }
  0x93   :  { %v83_v22 = vsel %vm79_vm1, %v71_v17, 0.0 }
  0x94   :  { %v73_v18 = vpop.f32.mrf.mxu2 }
  0x95   :  { %v74_v19 = vadd.f32 %v245_v12, %v73_v18 }
  0x96   :  { %v76_v20 = vpop.f32.mrf.mxu3 }
  0x97   :  { %v86_v21 = vsel %vm79_vm1, %v74_v19, 0.0  ;;  %v77_v23 = vadd.f32 %v245_v12, %v76_v20 }
  0x98   :  { %87 = vadd.xlane.f32.xlu1 %v86_v21 }
  0x99   :  { %v89_v24 = vsel %vm79_vm1, %v77_v23, 0.0 }
  0x9a   :  { %84 = vadd.xlane.f32.xlu0 %v83_v22 }
  0xa0   :  { %90 = vadd.xlane.f32.xlu1 %v89_v24 }
 0x105   :  { %v82_v32 = vpop.xlane.xlu0 %81 }
 0x106   :  { %v99_v33 = vmul.f32 %v98_v31, %v82_v32 }
 0x108   :  { %v103_v34 = vsub.f32 %v68_v14, %v99_v33 }
 0x10a   :  { %v107_v35 = vmul.f32 %v103_v34, %v103_v34 }
 0x10b   :  { %v88_v36 = vpop.xlane.xlu1 %87 }
 0x10c   :  { %v101_v37 = vmul.f32 %v98_v31, %v88_v36  ;;  %v111_v38 = vsel %vm79_vm1, %v107_v35, 0.0 }
 0x10d   :  { %112 = vadd.xlane.f32.xlu2 %v111_v38  ;;  %v85_v39 = vpop.xlane.xlu0 %84 }
 0x10e   :  { %v362_v40 = vsub.f32 %v74_v19, %v101_v37  ;;  %v100_v41 = vmul.f32 %v98_v31, %v85_v39 }
 0x110   :  { %v364_v42 = vsub.f32 %v71_v17, %v100_v41  ;;  %v109_v43 = vmul.f32 %v362_v40, %v362_v40 }
 0x112   :  { %v117_v44 = vsel %vm79_vm1, %v109_v43, 0.0  ;;  %v108_v45 = vmul.f32 %v364_v42, %v364_v42 }
 0x113   :  { %v91_v46 = vpop.xlane.xlu1 %90  ;;  %118 = vadd.xlane.f32.xlu0 %v117_v44 }
 0x114   :  { %v102_v47 = vmul.f32 %v98_v31, %v91_v46  ;;  %v114_v48 = vsel %vm79_vm1, %v108_v45, 0.0 }
 0x115   :  { %115 = vadd.xlane.f32.xlu2 %v114_v48 }
 0x116   :  { %v372_v49 = vsub.f32 %v77_v23, %v102_v47 }
 0x118   :  { %v110_v50 = vmul.f32 %v372_v49, %v372_v49 }
 0x11a   :  { %v120_v51 = vsel %vm79_vm1, %v110_v50, 0.0 }
 0x11b   :  { %121 = vadd.xlane.f32.xlu1 %v120_v51 }
 0x180   :  { %v113_v52 = vpop.xlane.xlu2 %112 }
 0x181   :  { %v123_v53 = vmul.f32 %v113_v52, %v98_v31 }
 0x183   :  { %v127_v54 = vadd.f32 1e-05, %v123_v53 }
 0x185   :  { %250 = vrsqrt.f32 %v127_v54  ;;  %vm137_vm4 = vweird.f32 %v127_v54 }
 0x186   :  { %v119_v55 = vpop.xlane.xlu0 %118 }
 0x187   :  { %v125_v56 = vmul.f32 %v119_v55, %v98_v31 }
 0x188   :  { %v116_v57 = vpop.xlane.xlu2 %115 }
 0x189   :  { %v129_v58 = vadd.f32 1e-05, %v125_v56  ;;  %v124_v59 = vmul.f32 %v116_v57, %v98_v31 }
 0x18b   :  { %v251_v60 = vpop.eup %250  ;;  %252 = vrsqrt.f32 %v129_v58  ;;  %v128_v61 = vadd.f32 1e-05, %v124_v59  ;;  %vm157_vm7 = vweird.f32 %v129_v58 }
 0x18c   :  { %v132_v62 = vmul.f32 %v251_v60, %v127_v54  ;;  %vm138_vm3 = vweird.f32 %v251_v60 }
 0x18d   :  { %254 = vrsqrt.f32 %v128_v61  ;;  %vm139_vm5 = vmor %vm137_vm4, %vm138_vm3  ;;  %vm147_vm10 = vweird.f32 %v128_v61 }
 0x18e   :  { %v133_v63 = vmul.f32 %v251_v60, %v132_v62  ;;  %v122_v0 = vpop.xlane.xlu1 %121 }
 0x18f   :  { %v126_v1 = vmul.f32 %v122_v0, %v98_v31 }
 0x190   :  { %v134_v2 = vmul.f32 0.5, %v133_v63 }
 0x191   :  { %v253_v3 = vpop.eup %252  ;;  %v130_v4 = vadd.f32 1e-05, %v126_v1 }
 0x192   :  { %v135_v5 = vsub.f32 1.5, %v134_v2  ;;  %v152_v6 = vmul.f32 %v253_v3, %v129_v58  ;;  %vm158_vm6 = vweird.f32 %v253_v3 }
 0x193   :  { %v255_v7 = vpop.eup %254  ;;  %256 = vrsqrt.f32 %v130_v4  ;;  %vm159_vm9 = vmor %vm157_vm7, %vm158_vm6  ;;  %vm167_vm13 = vweird.f32 %v130_v4 }
 0x194   :  { %v136_v8 = vmul.f32 %v251_v60, %v135_v5  ;;  %v153_v9 = vmul.f32 %v253_v3, %v152_v6  ;;  %v142_v10 = vmul.f32 %v255_v7, %v128_v61  ;;  %vm148_vm8 = vweird.f32 %v255_v7 }
 0x195   :  { %vm149_vm11 = vmor %vm147_vm10, %vm148_vm8 }
 0x196   :  { %v140_v12 = vsel %vm139_vm5, %v251_v60, %v136_v8  ;;  %v154_v13 = vmul.f32 0.5, %v153_v9  ;;  %v143_v14 = vmul.f32 %v255_v7, %v142_v10 }
 0x197   :  { %v171_v16 = vmul.f32 %v140_v12, %v103_v34 }
 0x198   :  { %v155_v17 = vsub.f32 1.5, %v154_v13  ;;  %v144_v18 = vmul.f32 0.5, %v143_v14 }
 0x199   :  { %v257_v19 = vpop.eup %256  ;;  %v179_v20 = vmul.f32 %v246_v11, %v171_v16 }
 0x19a   :  { %v156_v21 = vmul.f32 %v253_v3, %v155_v17  ;;  %v145_v22 = vsub.f32 1.5, %v144_v18  ;;  %v162_v23 = vmul.f32 %v257_v19, %v130_v4  ;;  %vm168_vm12 = vweird.f32 %v257_v19 }
 0x19b   :  { %v187_v24 = vadd.f32 %v247_v15, %v179_v20  ;;  %vm169_vm14 = vmor %vm167_vm13, %vm168_vm12 }
 0x19c   :  { %v160_v25 = vsel %vm159_vm9, %v253_v3, %v156_v21  ;;  %v146_v26 = vmul.f32 %v255_v7, %v145_v22  ;;  %v163_v27 = vmul.f32 %v257_v19, %v162_v23 }
 0x19d   :  { %191 = vst.msk [vmem:[#allocation2] sm:$0xff] %vm79_vm1, %v187_v24  ;;  %v173_v28 = vmul.f32 %v160_v25, %v362_v40 }
 0x19e   :  { %v150_v29 = vsel %vm149_vm11, %v255_v7, %v146_v26  ;;  %v164_v30 = vmul.f32 0.5, %v163_v27 }
 0x19f   :  { %v181_v31 = vmul.f32 %v246_v11, %v173_v28  ;;  %v172_v32 = vmul.f32 %v150_v29, %v364_v42 }
 0x1a0   :  { %v165_v33 = vsub.f32 1.5, %v164_v30 }
 0x1a1   :  { %v189_v34 = vadd.f32 %v247_v15, %v181_v31  ;;  %v180_v35 = vmul.f32 %v246_v11, %v172_v32 }
 0x1a2   :  { %v166_v36 = vmul.f32 %v257_v19, %v165_v33 }
 0x1a3   :  { %193 = vst.msk [vmem:[#allocation2 + $0x10] sm:$0xff] %vm79_vm1, %v189_v34  ;;  %v188_v37 = vadd.f32 %v247_v15, %v180_v35 }
 0x1a4   :  { %v170_v38 = vsel %vm169_vm14, %v257_v19, %v166_v36 }
 0x1a5   :  { %192 = vst.msk [vmem:[#allocation2 + $0x8] sm:$0xff] %vm79_vm1, %v188_v37  ;;  %v174_v39 = vmul.f32 %v170_v38, %v372_v49 }
 0x1a7   :  { %v182_v40 = vmul.f32 %v246_v11, %v174_v39 }
 0x1a9   :  { %v190_v41 = vadd.f32 %v247_v15, %v182_v40 }
 0x1ab   :  { %194 = vst.msk [vmem:[#allocation2 + $0x18] sm:$0xff] %vm79_vm1, %v190_v41 }
 0x1ac   :  { %207 = dma.vmem_to_hbm [thread:$0]  %s200_s4, 512, %s202_s22, [#allocation3], %s286_s23, %s286_s23, %s287_s24  }
 0x1ad   :  { %282 = dma.done.wait [#allocation3], 512  }
 0x1ae   :  { %283 = vsyncadd [#allocation3], 4294966784 }
 0x1af   :  { %212 = vsyncpa [#allocation3], 1 }

</bundles_post_ra>
